<compile_context>
chip_gen: v7x
topology: tpu7x:2x2x1
jax: 0.10.0
libtpu: 0.0.40
codegen_flags: <defaults>
</compile_context>

<pallas_src>
import functools

import jax
import jax.numpy as jnp
from jax.experimental import pallas as pl
from jax.experimental.pallas import tpu as pltpu


def _round_up(x, m):
    return -(-x // m) * m


def _prefer_channels_last(C, HW):
    """Put a 128-multiple (or failing that, the larger) dim on the lane axis."""
    hw_ok = HW % 128 == 0
    c_ok = C % 128 == 0
    if hw_ok != c_ok:
        return c_ok
    return C >= HW


# ---------------------------------------------------------------------------
# Kernels.  One grid step == one batch image.
#   channels-first:  x block (1, C, HW) -> spatial mean is a lane reduce
#   channels-last :  x block (1, HW, C) -> spatial mean is a sublane reduce,
#                                          loads/stores lane-dense in C
# ---------------------------------------------------------------------------

def _excite(y, w1_ref, w2_ref):
    """(1, C) pooled features -> (1, C) sigmoid gate.

    MXU matmuls accumulate in f32; activations are cast to the weight dtype
    (f32 or bf16) for the MXU, all pointwise math stays f32.
    NOTE: at toy sizes (C=4) these matmuls are degenerate for the MXU; at
    realistic SE sizes (C >= 128, HIDDEN padded to a 256 multiple) they map to
    full MXU passes, so jnp.dot is kept per the review's conditional guidance.
    """
    h = jnp.dot(y.astype(w1_ref.dtype), w1_ref[...],
                preferred_element_type=jnp.float32)          # (1, HIDDEN_P)
    h = jnp.maximum(h, 0.0)
    s = jnp.dot(h.astype(w2_ref.dtype), w2_ref[...],
                preferred_element_type=jnp.float32)          # (1, C)
    return jax.nn.sigmoid(s)                                 # exp/recip on EUP


def se_kernel_cf(x_ref, w1_ref, w2_ref, o_ref, *, inv_hw):
    x = x_ref[...]                                   # (1, C, HW) f32
    y = jnp.sum(x, axis=-1) * inv_hw                 # lane reduce + one scale
    s = _excite(y, w1_ref, w2_ref)                   # (1, C)
    o_ref[...] = (x * s[:, :, None]).astype(o_ref.dtype)


def se_kernel_cl(x_ref, w1_ref, w2_ref, o_ref, *, inv_hw):
    x = x_ref[...]                                   # (1, HW, C) f32
    y = jnp.sum(x, axis=1) * inv_hw                  # sublane reduce + scale
    s = _excite(y, w1_ref, w2_ref)                   # (1, C)
    o_ref[...] = (x * s[:, None, :]).astype(o_ref.dtype)


# ---------------------------------------------------------------------------
# Wrapper
# ---------------------------------------------------------------------------

def se_module(x, w1, w2, *, weight_dtype=None):
    """SEModule forward.

    x:  (B, C, H, W) float32 (NCHW, as in PyTorch)
    w1: (C, HIDDEN)  first Linear, stored pre-transposed as (in, out)
    w2: (HIDDEN, C)  second Linear, stored pre-transposed as (in, out)
    weight_dtype: optionally cast weights (e.g. jnp.bfloat16 for v6e/v7x MXU).
    """
    B, C, H, W = x.shape
    HW = H * W
    hidden = w1.shape[1]

    # Pad HIDDEN up to a multiple of 256 (MXU tile on v6e/v7x, 128-lane
    # multiple everywhere).  Exact: zero hidden units stay zero through ReLU
    # and multiply the zero rows of w2.
    hidden_p = _round_up(hidden, 256)
    if hidden_p != hidden:
        w1 = jnp.pad(w1, ((0, 0), (0, hidden_p - hidden)))
        w2 = jnp.pad(w2, ((0, hidden_p - hidden), (0, 0)))
    if weight_dtype is not None:
        w1 = w1.astype(weight_dtype)
        w2 = w2.astype(weight_dtype)

    channels_last = _prefer_channels_last(C, HW)
    inv_hw = 1.0 / float(HW)

    if channels_last:
        x3 = jnp.transpose(x.reshape(B, C, HW), (0, 2, 1))      # (B, HW, C)
        kernel = functools.partial(se_kernel_cl, inv_hw=inv_hw)
        x_spec = pl.BlockSpec((1, HW, C), lambda b: (b, 0, 0))
        out_shape = jax.ShapeDtypeStruct((B, HW, C), x.dtype)
    else:
        x3 = x.reshape(B, C, HW)                                # (B, C, HW)
        kernel = functools.partial(se_kernel_cf, inv_hw=inv_hw)
        x_spec = pl.BlockSpec((1, C, HW), lambda b: (b, 0, 0))
        out_shape = jax.ShapeDtypeStruct((B, C, HW), x.dtype)

    out3 = pl.pallas_call(
        kernel,
        out_shape=out_shape,
        grid=(B,),
        in_specs=[
            x_spec,                                          # streamed per-image
            pl.BlockSpec((C, hidden_p), lambda b: (0, 0)),   # resident weights
            pl.BlockSpec((hidden_p, C), lambda b: (0, 0)),   # resident weights
        ],
        out_specs=x_spec,
        compiler_params=pltpu.CompilerParams(
            # one image per grid step; v7x's two TensorCores split the batch
            dimension_semantics=("parallel",),
        ),
        # NOTE: input_output_aliases={0: 0} could reuse x's HBM buffer for the
        # output once the caller can donate x; left off here so x stays live.
    )(x3, w1, w2)

    if channels_last:
        return jnp.transpose(out3, (0, 2, 1)).reshape(B, C, H, W)
    return out3.reshape(B, C, H, W)


def se_module_ref(x, w1, w2):
    """Pure-JAX reference mirroring the PyTorch forward."""
    y = jnp.mean(x, axis=(2, 3))                 # (B, C)
    h = jnp.maximum(y @ w1, 0.0)                 # (B, HIDDEN)
    s = jax.nn.sigmoid(h @ w2)                   # (B, C)
    return x * s[:, :, None, None]


if __name__ == "__main__":
    HIDDEN = 1000                 # nn.Linear(in_channels, 1000)
    key = jax.random.PRNGKey(0)
    kx, k1, k2, kx2, k3, k4 = jax.random.split(key, 6)

    # ---- test 1: toy NCHW shape, f32 weights, channels-first (HW=256) ----
    B, C, H, W = 2, 4, 16, 16     # in_channels == out_channels == C (required
                                  # by the PyTorch forward's view(b, c, 1, 1))
    x = jax.random.normal(kx, (B, C, H, W), dtype=jnp.float32)
    w1 = jax.random.normal(k1, (C, HIDDEN), dtype=jnp.float32) * (1.0 / C ** 0.5)
    w2 = jax.random.normal(k2, (HIDDEN, C), dtype=jnp.float32) * (1.0 / HIDDEN ** 0.5)

    out = jax.block_until_ready(se_module(x, w1, w2))
    ref = se_module_ref(x, w1, w2)
    assert out.shape == (B, C, H, W)
    assert jnp.allclose(out, ref, atol=1e-5, rtol=1e-5), "mismatch vs reference (f32)"

    # ---- test 2: small-spatial / 128-channel shape -> channels-last path,
    #              bf16 weights on the MXU (v6e/v7x sweet spot) ------------
    B2, C2, H2, W2 = 2, 128, 7, 7
    x2 = jax.random.normal(kx2, (B2, C2, H2, W2), dtype=jnp.float32)
    w1b = jax.random.normal(k3, (C2, HIDDEN), dtype=jnp.float32) * (1.0 / C2 ** 0.5)
    w2b = jax.random.normal(k4, (HIDDEN, C2), dtype=jnp.float32) * (1.0 / HIDDEN ** 0.5)

    out2 = jax.block_until_ready(
        se_module(x2, w1b, w2b, weight_dtype=jnp.bfloat16))
    ref2 = se_module_ref(x2, w1b, w2b)
    assert out2.shape == (B2, C2, H2, W2)
    assert jnp.allclose(out2, ref2, atol=2e-2, rtol=2e-2), "mismatch vs reference (bf16)"

    print("KERNEL_OK")
</pallas_src>

<mosaic_0001>
module attributes {stable_mosaic.version = 11 : i64} {
  func.func @se_kernel_cf(%arg0: i32, %arg1: memref<1x4x256xf32, #tpu.memory_space<vmem>>, %arg2: memref<4x1024xf32, #tpu.memory_space<vmem>>, %arg3: memref<1024x4xf32, #tpu.memory_space<vmem>>, %arg4: memref<1x4x256xf32, #tpu.memory_space<vmem>>) attributes {dimension_semantics = [#tpu.dimension_semantics<parallel>], iteration_bounds = array<i64: 2>, scalar_prefetch = 0 : i64, scratch_operands = 0 : i64, tpu.core_type = #tpu.core_type<tc>, window_params = [{transform_indices = @transform_0, window_bounds = array<i64: 1, 4, 256>}, {pipeline_mode = #tpu.pipeline_mode<synchronous>, transform_indices = @transform_1, window_bounds = array<i64: 4, 1024>}, {pipeline_mode = #tpu.pipeline_mode<synchronous>, transform_indices = @transform_2, window_bounds = array<i64: 1024, 4>}, {transform_indices = @transform_3, window_bounds = array<i64: 1, 4, 256>}]} {
    %c0 = arith.constant 0 : index
    %c0_0 = arith.constant 0 : index
    %c0_1 = arith.constant 0 : index
    %0 = vector.load %arg1[%c0, %c0_0, %c0_1] : memref<1x4x256xf32, #tpu.memory_space<vmem>>, vector<1x4x256xf32>
    %cst = arith.constant dense<0.000000e+00> : vector<1x4xf32>
    %1 = vector.multi_reduction <add>, %0, %cst [2] : vector<1x4x256xf32> to vector<1x4xf32>
    %cst_2 = arith.constant 3.906250e-03 : f32
    %2 = vector.broadcast %cst_2 : f32 to vector<1x4xf32>
    %3 = arith.mulf %1, %2 : vector<1x4xf32>
    %c0_3 = arith.constant 0 : index
    %c0_4 = arith.constant 0 : index
    %4 = vector.load %arg2[%c0_3, %c0_4] : memref<4x1024xf32, #tpu.memory_space<vmem>>, vector<4x1024xf32>
    %cst_5 = arith.constant dense<0.000000e+00> : vector<1x1024xf32>
    %5 = tpu.matmul %3, %4, %cst_5 {dimension_numbers = #tpu.dot_dimension_numbers<[1], [0], [0], [1], [0, 0, 1, 1], [], []>} : vector<1x4xf32>, vector<4x1024xf32>, vector<1x1024xf32> -> vector<1x1024xf32>
    %cst_6 = arith.constant 0.000000e+00 : f32
    %6 = vector.broadcast %cst_6 : f32 to vector<1x1024xf32>
    %7 = arith.maximumf %5, %6 : vector<1x1024xf32>
    %c0_7 = arith.constant 0 : index
    %c0_8 = arith.constant 0 : index
    %8 = vector.load %arg3[%c0_7, %c0_8] : memref<1024x4xf32, #tpu.memory_space<vmem>>, vector<1024x4xf32>
    %cst_9 = arith.constant dense<0.000000e+00> : vector<1x4xf32>
    %9 = tpu.matmul %7, %8, %cst_9 {dimension_numbers = #tpu.dot_dimension_numbers<[1], [0], [0], [1], [0, 0, 1, 1], [], []>} : vector<1x1024xf32>, vector<1024x4xf32>, vector<1x4xf32> -> vector<1x4xf32>
    %10 = arith.negf %9 : vector<1x4xf32>
    %11 = math.exp %10 : vector<1x4xf32>
    %cst_10 = arith.constant 1.000000e+00 : f32
    %12 = vector.broadcast %cst_10 : f32 to vector<1x4xf32>
    %13 = arith.addf %12, %11 : vector<1x4xf32>
    %14 = arith.divf %12, %13 : vector<1x4xf32>
    %15 = vector.shape_cast %14 : vector<1x4xf32> to vector<1x4x1xf32>
    %16 = vector.broadcast %15 : vector<1x4x1xf32> to vector<1x4x256xf32>
    %17 = arith.mulf %0, %16 : vector<1x4x256xf32>
    %c0_11 = arith.constant 0 : index
    %c0_12 = arith.constant 0 : index
    %c0_13 = arith.constant 0 : index
    %18 = vector.load %arg4[%c0_11, %c0_12, %c0_13] : memref<1x4x256xf32, #tpu.memory_space<vmem>>, vector<1x4x256xf32>
    tpu.vector_store %arg4[%c0_11, %c0_12, %c0_13], %17 {strides = array<i32>} : memref<1x4x256xf32, #tpu.memory_space<vmem>>, vector<1x4x256xf32>,
    return
  }
  func.func @transform_0(%arg0: i32) -> (i32, i32, i32) {
    %c0_i32 = arith.constant 0 : i32
    %c0_i32_0 = arith.constant 0 : i32
    %c0_i32_1 = arith.constant 0 : i32
    return %arg0, %c0_i32, %c0_i32_0 : i32, i32, i32
  }
  func.func @transform_1(%arg0: i32) -> (i32, i32) {
    %c0_i32 = arith.constant 0 : i32
    %c0_i32_0 = arith.constant 0 : i32
    %c0_i32_1 = arith.constant 0 : i32
    return %c0_i32, %c0_i32_0 : i32, i32
  }
  func.func @transform_2(%arg0: i32) -> (i32, i32) {
    %c0_i32 = arith.constant 0 : i32
    %c0_i32_0 = arith.constant 0 : i32
    %c0_i32_1 = arith.constant 0 : i32
    return %c0_i32, %c0_i32_0 : i32, i32
  }
  func.func @transform_3(%arg0: i32) -> (i32, i32, i32) {
    %c0_i32 = arith.constant 0 : i32
    %c0_i32_0 = arith.constant 0 : i32
    %c0_i32_1 = arith.constant 0 : i32
    return %arg0, %c0_i32, %c0_i32_0 : i32, i32, i32
  }
}

</mosaic_0001>

<bundles_post_ra>
// kernel: tpu_custom_call.1
= control target key start
LH: loop header
LB: loop body
LE: loop exit
PB: predicated region body
PF: predicated region fallthrough
CT: control target
= control target key end

     0   :  { %8 = vsyncpa [#allocation3], 0  ;;  %s1975_s0 = inlined_call_operand.vmem [shape: f32[2,4,256], index: 0, kind: input, shape index: {}]   ;;  %s1976_s1 = inlined_call_operand.vmem [shape: f32[4,1024], index: 1, kind: input, shape index: {}]   ;;  %s1977_s2 = inlined_call_operand.vmem [shape: f32[1024,4], index: 2, kind: input, shape index: {}]   ;;  %s1978_s3 = inlined_call_operand.hbm [shape: f32[2,4,256], index: 3, kind: output, shape index: {}]  }
   0x1   :  { %10 = vsyncpa [#allocation3 + $0x1], 0  ;;  %s1448_s12 = smov 0   ;;  %s1450_s13 = smov 0  }
   0x2   :  { %s1452_s14 = smov 0   ;;  %s1454_s15 = smov 0  }
   0x3 LB: > { %s1469_s16 = sadd.s32 4294967295, %s1423_s15   ;;  %s1016_s17 = sadd.s32 4294967294, %s1423_s15   ;;  %s1423_s15 = sphi %s1454_s15, %s1984_s15   ;;  %s1419_s14 = sphi %s1452_s14, %s1983_s14   ;;  %s1415_s13 = sphi %s1450_s13, %s1982_s13   ;;  %s1411_s12 = sphi %s1448_s12, %s1981_s12  }
   0x4   : > { %s1473_s18 = sadd.s32 1, %s1423_s15   ;;  %s91_s19 = sadd.s32 1, %s1419_s14 }
   0x5   : > { %s88_s20 = ssub.s32 %s1423_s15, %s1473_s18  ;;  %p101_p0 = scmp.ne.s32.totalorder %s1419_s14, %s1415_s13 }
   0x6   : > { %p89_p1 = scmp.eq.s32.totalorder %s88_s20, 0  ;;  %p102_p2 = scmp.eq.s32.totalorder %s1469_s16, 1 }
   0x7   : > { %p107_p3 = scmp.ne.s32.totalorder %s1415_s13, %s1411_s12  ;;  %p108_p4 = scmp.eq.s32.totalorder %s1016_s17, 1 }
   0x8   : > { %s1484_s21 = scalar_select %p89_p1, %s1419_s14, %s91_s19  }
   0x9   : > { %p1486_p5 = por %p102_p2, %p101_p0  ;;  %p1490_p6 = por %p108_p4, %p107_p3 }
   0xa   : > { %p1019_p7 = scmp.ge.s32.totalorder %s1423_s15, 1  ;;  %p140_p8 = scmp.lt.s32.totalorder %s1423_s15, 3 }
   0xc   : > { %p141_p9 = pnand %p1019_p7, %p140_p8 }
   0xd   : > { %p164_p10 = scmp.lt.s32.totalorder (!%p141_p9), %s1469_s16, 1  ;;  %vm173_vm0 = vcmask (!%p141_p9), 1043456   ;;  %v180_v5 = vld [vmem:[%s1976_s1] sm:$0xff] (!%p141_p9)  ;;  %v181_v6 = vld [vmem:[%s1976_s1 + $0x8] sm:$0xff] (!%p141_p9)  ;;  %v1425_v9 = vmov (!%p141_p9), 0.0   ;;  %v182_v10 = vld [vmem:[%s1976_s1 + $0x10] sm:$0xff] (!%p141_p9)  ;;  %v185_v14 = vlaneseq (!%p141_p9) }
   0xe   : > { %144 = sbr.rel (%p141_p9) target bundleno = 805 (0x325), region = 32  ;;  %v195_v7 = vcombine.high (!%p141_p9), %v180_v5, %v180_v5  ;;  %v196_v8 = vcombine.high (!%p141_p9), %v181_v6, %v181_v6  ;;  %282 = vmatprep.mubr.f32.mxu0 (!%p141_p9), %v1425_v9  ;;  %v183_v11 = vld [vmem:[%s1976_s1 + $0x18] sm:$0xff] (!%p141_p9)  ;;  %353 = vmatprep.mubr.f32.mxu1 (!%p141_p9), %v1425_v9  ;;  %v197_v12 = vcombine.high (!%p141_p9), %v182_v10, %v182_v10  ;;  %v526_v19 = vld [vmem:[%s1977_s2 + $0x80] sm:$0xff] (!%p141_p9)  ;;  %v527_v21 = vld [vmem:[%s1977_s2 + $0x88] sm:$0xff] (!%p141_p9)  ;;  %vm199_vm1 = vcmask (!%p141_p9), 31744   ;;  %s161_s20 = sand.u32 (!%p141_p9), 1, %s1415_s13  }
   0xf   : > { %v198_v13 = vcombine.high (!%p141_p9), %v183_v11, %v183_v11  ;;  %v186_v15 = vand.u32 (!%p141_p9), 127, %v185_v14  ;;  %v1526_v16 = vshrl.u32 (!%p141_p9), %v185_v14, 7  ;;  %v558_v22 = vld [vmem:[%s1977_s2 + $0x180] sm:$0xff] (!%p141_p9)  ;;  %v559_v23 = vld [vmem:[%s1977_s2 + $0x188] sm:$0xff] (!%p141_p9)  ;;  %v528_v29 = vld [vmem:[%s1977_s2 + $0x90] sm:$0xff] (!%p141_p9)  ;;  %v1183_v30 = vpack.c.bf16 (!%p141_p9), %v527_v21, %v526_v19  ;;  %s943_s4 = scalar_lea.sflag (!%p141_p9), [#allocation3], %s161_s20 }
  0x10   : > { %1023 = vmatprep.subr.msk.mxu0 (!%p141_p9), %vm173_vm0, %v195_v7  ;;  %1026 = vmatprep.subr.msk.mxu1 (!%p141_p9), %vm173_vm0, %v196_v8  ;;  %v510_v24 = vld [vmem:[%s1977_s2] sm:$0xff] (!%p141_p9)  ;;  %v511_v25 = vld [vmem:[%s1977_s2 + $0x8] sm:$0xff] (!%p141_p9)  ;;  %v1215_v31 = vpack.c.bf16 (!%p141_p9), %v559_v23, %v558_v22  ;;  %v529_v32 = vld [vmem:[%s1977_s2 + $0x98] sm:$0xff] (!%p141_p9) }
  0x11   : > { %1024 = vmatpush1.msk.msra.mxu0 (!%p141_p9), %vm173_vm0, %v180_v5  ;;  %1027 = vmatpush1.msk.msra.mxu1 (!%p141_p9), %vm173_vm0, %v181_v6  ;;  %v189_v17 = vsub.s32 (!%p141_p9), %v186_v15, %v1526_v16  ;;  %v542_v27 = vld [vmem:[%s1977_s2 + $0x100] sm:$0xff] (!%p141_p9)  ;;  %v543_v28 = vld [vmem:[%s1977_s2 + $0x108] sm:$0xff] (!%p141_p9)  ;;  %v560_v33 = vld [vmem:[%s1977_s2 + $0x190] sm:$0xff] (!%p141_p9)  ;;  %v1185_v35 = vpack.c.bf16 (!%p141_p9), %v511_v25, %v510_v24  ;;  %v1187_v39 = vpack.c.bf16 (!%p141_p9), %v529_v32, %v528_v29 }
  0x12   : > { %1029 = vmatprep.subr.msk.mxu0 (!%p141_p9), %vm173_vm0, %v197_v12  ;;  %1032 = vmatprep.subr.msk.mxu1 (!%p141_p9), %vm173_vm0, %v198_v13  ;;  %v561_v34 = vld [vmem:[%s1977_s2 + $0x198] sm:$0xff] (!%p141_p9)  ;;  %v1217_v36 = vpack.c.bf16 (!%p141_p9), %v543_v28, %v542_v27  ;;  %v512_v37 = vld [vmem:[%s1977_s2 + $0x10] sm:$0xff] (!%p141_p9)  ;;  %v530_v43 = vld [vmem:[%s1977_s2 + $0xa0] sm:$0xff] (!%p141_p9) }
  0x13   : > { %v513_v38 = vld [vmem:[%s1977_s2 + $0x18] sm:$0xff] (!%p141_p9)  ;;  %v1219_v40 = vpack.c.bf16 (!%p141_p9), %v561_v34, %v560_v33  ;;  %v544_v41 = vld [vmem:[%s1977_s2 + $0x110] sm:$0xff] (!%p141_p9)  ;;  %v531_v44 = vld [vmem:[%s1977_s2 + $0xa8] sm:$0xff] (!%p141_p9) }
  0x14   : > { %v545_v42 = vld [vmem:[%s1977_s2 + $0x118] sm:$0xff] (!%p141_p9)  ;;  %v562_v45 = vld [vmem:[%s1977_s2 + $0x1a0] sm:$0xff] (!%p141_p9)  ;;  %v563_v46 = vld [vmem:[%s1977_s2 + $0x1a8] sm:$0xff] (!%p141_p9)  ;;  %v1189_v47 = vpack.c.bf16 (!%p141_p9), %v513_v38, %v512_v37  ;;  %v1191_v51 = vpack.c.bf16 (!%p141_p9), %v531_v44, %v530_v43 }
  0x15   : > { %s165_s24 = scalar_select %p164_p10, %s1469_s16, 1  ;;  %v1221_v48 = vpack.c.bf16 %v545_v42, %v544_v41  ;;  %v514_v49 = vld [vmem:[%s1977_s2 + $0x20] sm:$0xff]  ;;  %v515_v50 = vld [vmem:[%s1977_s2 + $0x28] sm:$0xff]  ;;  %v1223_v52 = vpack.c.bf16 %v563_v46, %v562_v45  ;;  %v532_v55 = vld [vmem:[%s1977_s2 + $0xb0] sm:$0xff] }
  0x16   : > { %v546_v53 = vld [vmem:[%s1977_s2 + $0x120] sm:$0xff]  ;;  %v547_v54 = vld [vmem:[%s1977_s2 + $0x128] sm:$0xff]  ;;  %v533_v56 = vld [vmem:[%s1977_s2 + $0xb8] sm:$0xff]  ;;  %v1193_v59 = vpack.c.bf16 %v515_v50, %v514_v49 }
  0x17   : > { %s1041_s25 = sshll.u32 %s165_s24, 3  ;;  %v564_v57 = vld [vmem:[%s1977_s2 + $0x1b0] sm:$0xff]  ;;  %v565_v58 = vld [vmem:[%s1977_s2 + $0x1b8] sm:$0xff]  ;;  %v1225_v60 = vpack.c.bf16 %v547_v54, %v546_v53  ;;  %v1195_v63 = vpack.c.bf16 %v533_v56, %v532_v55  ;;  %v535_v5 = vld [vmem:[%s1977_s2 + $0xc8] sm:$0xff]  ;;  %s1020_s24 = sshll.u32 %s161_s20, 3 }
  0x18   : > { %s168_s28 = scalar_lea.vmem %s1975_s0, %s1041_s25  ;;  %v516_v61 = vld [vmem:[%s1977_s2 + $0x30] sm:$0xff]  ;;  %v517_v62 = vld [vmem:[%s1977_s2 + $0x38] sm:$0xff]  ;;  %v566_v6 = vld [vmem:[%s1977_s2 + $0x1c0] sm:$0xff]  ;;  %s1042_s25 = sshll.u32 %s1469_s16, 7 }
  0x19   : > { %v1501_v0 = vld [vmem:[%s168_s28] sm:$0xff]  ;;  %v567_v7 = vld [vmem:[%s1977_s2 + $0x1c8] sm:$0xff]  ;;  %v1197_v8 = vpack.c.bf16 %v517_v62, %v516_v61  ;;  %v568_v19 = vld [vmem:[%s1977_s2 + $0x1d0] sm:$0xff]  ;;  %s163_s26 = scalar_lea.vmem [#allocation2], %s1020_s24  ;;  %s1933_s30 = scalar_lea.hbm %s1978_s3, %s1042_s25 }
  0x1a   : > { %v171_v1 = vcombine.high %v1501_v0, %v1501_v0  ;;  %v174_v2 = vsel %vm173_vm0, %v1501_v0, 0.0  ;;  %v1231_v13 = vpack.c.bf16 %v567_v7, %v566_v6  ;;  %v550_v14 = vld [vmem:[%s1977_s2 + $0x140] sm:$0xff]  ;;  %v551_v15 = vld [vmem:[%s1977_s2 + $0x148] sm:$0xff]  ;;  %v520_v23 = vld [vmem:[%s1977_s2 + $0x50] sm:$0xff]  ;;  %s957_s27 = sshll.u32 %s163_s26, 4  ;;  %s1427_s16 = smov [#allocation2]   ;;  %s1935_s27 = int_to_ptr.vmem [resolvable:$true] %s957_s27 }
  0x1b   : > { %v1233_v22 = vpack.c.bf16 %v551_v15, %v550_v14  ;;  %v521_v24 = vld [vmem:[%s1977_s2 + $0x58] sm:$0xff]  ;;  %v552_v27 = vld [vmem:[%s1977_s2 + $0x150] sm:$0xff]  ;;  %v538_v29 = vld [vmem:[%s1977_s2 + $0xe0] sm:$0xff]  ;;  %s1361_s5 = scalar_lea.vmem %s1935_s27, 128  ;;  %s1365_s6 = sshll.u32 %s1427_s16, 4  ;;  %s1366_s6 = int_to_ptr.vmem [resolvable:$false] %s1365_s6 }
  0x1c   : > { %v175_v3 = vsel %vm173_vm0, %v171_v1, 0.0  ;;  %v1227_v1 = vpack.c.bf16 %v565_v58, %v564_v57  ;;  %v553_v28 = vld [vmem:[%s1977_s2 + $0x158] sm:$0xff]  ;;  %v571_v32 = vld [vmem:[%s1977_s2 + $0x1e8] sm:$0xff]  ;;  %v1205_v33 = vpack.c.bf16 %v521_v24, %v520_v23  ;;  %v540_v43 = vld [vmem:[%s1977_s2 + $0xf0] sm:$0xff]  ;;  %p1362_p11 = scmp.ne.s32.totalorder %s1935_s27, %s1361_s5  ;;  %s1367_s7 = scalar_lea.vmem %s1366_s6, 256 }
  0x1d   : > { %v176_v4 = vadd.f32 %v175_v3, %v174_v2  ;;  %v548_v2 = vld [vmem:[%s1977_s2 + $0x130] sm:$0xff]  ;;  %v549_v3 = vld [vmem:[%s1977_s2 + $0x138] sm:$0xff]  ;;  %v1237_v34 = vpack.c.bf16 %v553_v28, %v552_v27  ;;  %v523_v38 = vld [vmem:[%s1977_s2 + $0x68] sm:$0xff]  ;;  %p1368_p0 = scmp.lt.s32.totalorder %s1935_s27, %s1366_s6  ;;  %p1369_p1 = scmp.lt.s32.totalorder %s1367_s7, %s1361_s5 }
  0x1e   : > { %v541_v44 = vld [vmem:[%s1977_s2 + $0xf8] sm:$0xff]  ;;  %v572_v45 = vld [vmem:[%s1977_s2 + $0x1f0] sm:$0xff]  ;;  %v590_v55 = vld [vmem:[%s1977_s2 + $0x280] sm:$0xff]  ;;  %p1363_p12 = pnand %p1362_p11, %p1486_p5 }
  0x1f   : > { %177 = vadd.xlane.f32.xlu0 %v176_v4  ;;  %v534_v4 = vld [vmem:[%s1977_s2 + $0xc0] sm:$0xff]  ;;  %v1211_v46 = vpack.c.bf16 %v541_v44, %v540_v43  ;;  %v525_v49 = vld [vmem:[%s1977_s2 + $0x78] sm:$0xff]  ;;  %v591_v56 = vld [vmem:[%s1977_s2 + $0x288] sm:$0xff]  ;;  %p1370_p2 = por %p1369_p1, %p1368_p0 }
  0x20   : > { %v1199_v12 = vpack.c.bf16 %v535_v5, %v534_v4  ;;  %v557_v53 = vld [vmem:[%s1977_s2 + $0x178] sm:$0xff]  ;;  %v622_v57 = vld [vmem:[%s1977_s2 + $0x380] sm:$0xff]  ;;  %v1247_v58 = vpack.c.bf16 %v591_v56, %v590_v55  ;;  %v575_v62 = vld [vmem:[%s1977_s2 + $0x208] sm:$0xff]  ;;  %p1364_p13 = pneg %p1363_p12 }
  0x21   : > { %v574_v61 = vld [vmem:[%s1977_s2 + $0x200] sm:$0xff]  ;;  %v593_v5 = vld [vmem:[%s1977_s2 + $0x298] sm:$0xff]  ;;  %v624_v6 = vld [vmem:[%s1977_s2 + $0x390] sm:$0xff] }
  0x22   : > { %v625_v7 = vld [vmem:[%s1977_s2 + $0x398] sm:$0xff]  ;;  %v576_v14 = vld [vmem:[%s1977_s2 + $0x210] sm:$0xff]  ;;  %v594_v23 = vld [vmem:[%s1977_s2 + $0x2a0] sm:$0xff]  ;;  %p1371_p3 = pnand %p1370_p2, %p1364_p13 }
  0x23   : > { %v577_v15 = vld [vmem:[%s1977_s2 + $0x218] sm:$0xff]  ;;  %v626_v27 = vld [vmem:[%s1977_s2 + $0x3a0] sm:$0xff]  ;;  %v627_v28 = vld [vmem:[%s1977_s2 + $0x3a8] sm:$0xff] }
  0x24   : > { %v628_v43 = vld [vmem:[%s1977_s2 + $0x3b0] sm:$0xff]  ;;  %v629_v44 = vld [vmem:[%s1977_s2 + $0x3b8] sm:$0xff]  ;;  %v630_v55 = vld [vmem:[%s1977_s2 + $0x3c0] sm:$0xff] }
  0x25   : > { %v631_v56 = vld [vmem:[%s1977_s2 + $0x3c8] sm:$0xff] }
  0xac   : > { %v178_v18 = vpop.xlane.xlu0 %177 }
  0xad   : > { %v179_v20 = vmul.f32 0.00390625, %v178_v18  ;;  %v537_v18 = vld [vmem:[%s1977_s2 + $0xd8] sm:$0xff] }
  0xaf   : > { %v190_v26 = vrot.slane %v179_v20, %v189_v17  ;;  %v536_v17 = vld [vmem:[%s1977_s2 + $0xd0] sm:$0xff]  ;;  %v569_v20 = vld [vmem:[%s1977_s2 + $0x1d8] sm:$0xff] }
  0xb0   : > { %v1203_v25 = vpack.c.bf16 %v537_v18, %v536_v17 }
  0xb1   : > { %1025 = vmatmul.mubr.msk.f32.vlgmr.msra.gmra.mrb[0].mxu0 %vm199_vm1, %v190_v26  ;;  %1028 = vmatmul.mubr.msk.f32.vlgmr.msra.gmra.mrb[0].mxu1 %vm199_vm1, %v190_v26 }
  0xb2   : > { %1030 = vmatpush1.msk.msra.mxu0 %vm173_vm0, %v182_v10  ;;  %424 = vmatprep.mubr.f32.mxu0 %v1425_v9  ;;  %v518_v10 = vld [vmem:[%s1977_s2 + $0x40] sm:$0xff] }
  0xb3   : > { %1033 = vmatpush1.msk.msra.mxu1 %vm173_vm0, %v183_v11  ;;  %495 = vmatprep.mubr.f32.mxu1 %v1425_v9  ;;  %v1229_v9 = vpack.c.bf16 %v549_v3, %v548_v2  ;;  %v519_v11 = vld [vmem:[%s1977_s2 + $0x48] sm:$0xff]  ;;  %v592_v2 = vld [vmem:[%s1977_s2 + $0x290] sm:$0xff] }
  0xb4   : > { %1184 = vmatprep.subr.bf16.mxu0 %v1183_v30  ;;  %1216 = vmatprep.subr.bf16.mxu1 %v1215_v31  ;;  %v1201_v21 = vpack.c.bf16 %v519_v11, %v518_v10  ;;  %v539_v30 = vld [vmem:[%s1977_s2 + $0xe8] sm:$0xff]  ;;  %v570_v31 = vld [vmem:[%s1977_s2 + $0x1e0] sm:$0xff] }
  0xb5   : > { %1031 = vmatmul.mubr.msk.f32.vlgmr.msra.gmra.mrb[2].mxu0 %vm199_vm1, %v190_v26  ;;  %1034 = vmatmul.mubr.msk.f32.vlgmr.msra.gmra.mrb[2].mxu1 %vm199_vm1, %v190_v26  ;;  %v1235_v26 = vpack.c.bf16 %v569_v20, %v568_v19  ;;  %v1239_v37 = vpack.c.bf16 %v571_v32, %v570_v31  ;;  %v1251_v19 = vpack.c.bf16 %v593_v5, %v592_v2  ;;  %v600_v2 = vld [vmem:[%s1977_s2 + $0x2d0] sm:$0xff]  ;;  %v633_v5 = vld [vmem:[%s1977_s2 + $0x3d8] sm:$0xff] }
  0xb6   : > { %1186 = vmatpush3.bf16.msra.mxu0 %v1185_v35  ;;  %1218 = vmatpush3.bf16.msra.mxu1 %v1217_v36  ;;  %v522_v35 = vld [vmem:[%s1977_s2 + $0x60] sm:$0xff]  ;;  %v1207_v36 = vpack.c.bf16 %v539_v30, %v538_v29  ;;  %v1283_v20 = vpack.c.bf16 %v625_v7, %v624_v6 }
  0xb7   : > { %1188 = vmatprep.subr.bf16.mxu0 %v1187_v39  ;;  %1220 = vmatprep.subr.bf16.mxu1 %v1219_v40  ;;  %v554_v39 = vld [vmem:[%s1977_s2 + $0x160] sm:$0xff]  ;;  %v555_v40 = vld [vmem:[%s1977_s2 + $0x168] sm:$0xff]  ;;  %v1209_v41 = vpack.c.bf16 %v523_v38, %v522_v35  ;;  %v1287_v38 = vpack.c.bf16 %v627_v28, %v626_v27 }
  0xb8   : > { %v1241_v42 = vpack.c.bf16 %v555_v40, %v554_v39  ;;  %v578_v35 = vld [vmem:[%s1977_s2 + $0x220] sm:$0xff]  ;;  %v611_v40 = vld [vmem:[%s1977_s2 + $0x328] sm:$0xff] }
  0xb9   : > { %v610_v39 = vld [vmem:[%s1977_s2 + $0x320] sm:$0xff]  ;;  %v619_v28 = vld [vmem:[%s1977_s2 + $0x368] sm:$0xff] }
  0xba   : > { %1190 = vmatpush3.bf16.msra.mxu0 %v1189_v47  ;;  %1222 = vmatpush3.bf16.msra.mxu1 %v1221_v48  ;;  %v573_v47 = vld [vmem:[%s1977_s2 + $0x1f8] sm:$0xff]  ;;  %v524_v48 = vld [vmem:[%s1977_s2 + $0x70] sm:$0xff]  ;;  %v618_v27 = vld [vmem:[%s1977_s2 + $0x360] sm:$0xff] }
  0xbb   : > { %1192 = vmatprep.subr.bf16.mxu0 %v1191_v51  ;;  %1224 = vmatprep.subr.bf16.mxu1 %v1223_v52  ;;  %v1243_v50 = vpack.c.bf16 %v573_v47, %v572_v45  ;;  %v1213_v51 = vpack.c.bf16 %v525_v49, %v524_v48  ;;  %v556_v52 = vld [vmem:[%s1977_s2 + $0x170] sm:$0xff]  ;;  %v581_v48 = vld [vmem:[%s1977_s2 + $0x238] sm:$0xff] }
  0xbc   : > { %v1245_v54 = vpack.c.bf16 %v557_v53, %v556_v52  ;;  %v580_v47 = vld [vmem:[%s1977_s2 + $0x230] sm:$0xff]  ;;  %v613_v52 = vld [vmem:[%s1977_s2 + $0x338] sm:$0xff]  ;;  %v598_v53 = vld [vmem:[%s1977_s2 + $0x2c0] sm:$0xff] }
  0xbe   : > { %1194 = vmatpush3.bf16.msra.mxu0 %v1193_v59  ;;  %1226 = vmatpush3.bf16.msra.mxu1 %v1225_v60  ;;  %v623_v59 = vld [vmem:[%s1977_s2 + $0x388] sm:$0xff] }
  0xbf   : > { %1196 = vmatprep.subr.bf16.mxu0 %v1195_v63  ;;  %1228 = vmatprep.subr.bf16.mxu1 %v1227_v1  ;;  %v1279_v60 = vpack.c.bf16 %v623_v59, %v622_v57  ;;  %v606_v63 = vld [vmem:[%s1977_s2 + $0x300] sm:$0xff]  ;;  %v607_v1 = vld [vmem:[%s1977_s2 + $0x308] sm:$0xff]  ;;  %v1261_v57 = vpack.c.bf16 %v581_v48, %v580_v47 }
  0xc0   : > { %v582_v59 = vld [vmem:[%s1977_s2 + $0x240] sm:$0xff] }
  0xc2   : > { %1198 = vmatpush3.bf16.msra.mxu0 %v1197_v8  ;;  %1230 = vmatpush3.bf16.msra.mxu1 %v1229_v9 }
  0xc3   : > { %1200 = vmatprep.subr.bf16.mxu0 %v1199_v12  ;;  %1232 = vmatprep.subr.bf16.mxu1 %v1231_v13  ;;  %v1249_v12 = vpack.c.bf16 %v575_v62, %v574_v61  ;;  %v1281_v13 = vpack.c.bf16 %v607_v1, %v606_v63  ;;  %v1295_v62 = vpack.c.bf16 %v631_v56, %v630_v55  ;;  %v614_v63 = vld [vmem:[%s1977_s2 + $0x340] sm:$0xff]  ;;  %v615_v1 = vld [vmem:[%s1977_s2 + $0x348] sm:$0xff] }
  0xc4   : > { %v1297_v7 = vpack.c.bf16 %v615_v1, %v614_v63  ;;  %v1426_v1 = vmov 839922192  }
  0xc6   : > { %1202 = vmatpush3.bf16.msra.mxu0 %v1201_v21  ;;  %1234 = vmatpush3.bf16.msra.mxu1 %v1233_v22  ;;  %v608_v21 = vld [vmem:[%s1977_s2 + $0x310] sm:$0xff]  ;;  %v609_v22 = vld [vmem:[%s1977_s2 + $0x318] sm:$0xff] }
  0xc7   : > { %1204 = vmatprep.subr.bf16.mxu0 %v1203_v25  ;;  %1236 = vmatprep.subr.bf16.mxu1 %v1235_v26  ;;  %v595_v26 = vld [vmem:[%s1977_s2 + $0x2a8] sm:$0xff] }
  0xca   : > { %1206 = vmatpush3.bf16.msra.mxu0 %v1205_v33  ;;  %1238 = vmatpush3.bf16.msra.mxu1 %v1237_v34  ;;  %v1253_v33 = vpack.c.bf16 %v577_v15, %v576_v14  ;;  %v1285_v34 = vpack.c.bf16 %v609_v22, %v608_v21  ;;  %v602_v14 = vld [vmem:[%s1977_s2 + $0x2e0] sm:$0xff]  ;;  %v603_v15 = vld [vmem:[%s1977_s2 + $0x2e8] sm:$0xff] }
  0xcb   : > { %1208 = vmatprep.subr.bf16.mxu0 %v1207_v36  ;;  %1240 = vmatprep.subr.bf16.mxu1 %v1239_v37  ;;  %v579_v36 = vld [vmem:[%s1977_s2 + $0x228] sm:$0xff]  ;;  %v1255_v37 = vpack.c.bf16 %v595_v26, %v594_v23  ;;  %v586_v21 = vld [vmem:[%s1977_s2 + $0x260] sm:$0xff]  ;;  %v1271_v23 = vpack.c.bf16 %v603_v15, %v602_v14 }
  0xcc   : > { %v1257_v45 = vpack.c.bf16 %v579_v36, %v578_v35  ;;  %v587_v22 = vld [vmem:[%s1977_s2 + $0x268] sm:$0xff]  ;;  %v588_v35 = vld [vmem:[%s1977_s2 + $0x270] sm:$0xff] }
  0xce   : > { %1210 = vmatpush3.bf16.msra.mxu0 %v1209_v41  ;;  %1242 = vmatpush3.bf16.msra.mxu1 %v1241_v42  ;;  %v596_v41 = vld [vmem:[%s1977_s2 + $0x2b0] sm:$0xff]  ;;  %v597_v42 = vld [vmem:[%s1977_s2 + $0x2b8] sm:$0xff] }
  0xcf   : > { %1212 = vmatprep.subr.bf16.mxu0 %v1211_v46  ;;  %1244 = vmatprep.subr.bf16.mxu1 %v1243_v50  ;;  %v1289_v46 = vpack.c.bf16 %v611_v40, %v610_v39  ;;  %v1259_v49 = vpack.c.bf16 %v597_v42, %v596_v41  ;;  %v1291_v50 = vpack.c.bf16 %v629_v44, %v628_v43  ;;  %v620_v39 = vld [vmem:[%s1977_s2 + $0x370] sm:$0xff]  ;;  %v621_v40 = vld [vmem:[%s1977_s2 + $0x378] sm:$0xff] }
  0xd0   : > { %v1309_v42 = vpack.c.bf16 %v621_v40, %v620_v39 }
  0xd2   : > { %1214 = vmatpush3.bf16.msra.mxu0 %v1213_v51  ;;  %1246 = vmatpush3.bf16.msra.mxu1 %v1245_v54  ;;  %v612_v51 = vld [vmem:[%s1977_s2 + $0x330] sm:$0xff]  ;;  %v599_v54 = vld [vmem:[%s1977_s2 + $0x2c8] sm:$0xff] }
  0xd3   : > { %1248 = vmatprep.subr.bf16.mxu0 %v1247_v58  ;;  %1280 = vmatprep.subr.bf16.mxu1 %v1279_v60  ;;  %v1293_v58 = vpack.c.bf16 %v613_v52, %v612_v51  ;;  %v583_v60 = vld [vmem:[%s1977_s2 + $0x248] sm:$0xff]  ;;  %v1263_v61 = vpack.c.bf16 %v599_v54, %v598_v53 }
  0xd4   : > { %v1265_v6 = vpack.c.bf16 %v583_v60, %v582_v59 }
 0x184   : > { %v284_v3 = vpop.f32.mrb[0].mxu0  ;;  %v355_v4 = vpop.f32.mrb[0].mxu1 }
 0x185   : > { %v286_v8 = vpop.f32.mrb[1].mxu0  ;;  %v357_v9 = vpop.f32.mrb[1].mxu1  ;;  %v502_v17 = vmax.f32 %v284_v3, 0.0  ;;  %v504_v18 = vmax.f32 %v355_v4, 0.0  ;;  %v601_v3 = vld [vmem:[%s1977_s2 + $0x2d8] sm:$0xff]  ;;  %v632_v4 = vld [vmem:[%s1977_s2 + $0x3d0] sm:$0xff] }
 0x186   : > { %v503_v10 = vmax.f32 %v286_v8, 0.0  ;;  %v505_v11 = vmax.f32 %v357_v9, 0.0  ;;  %v584_v8 = vld [vmem:[%s1977_s2 + $0x250] sm:$0xff]  ;;  %v585_v9 = vld [vmem:[%s1977_s2 + $0x258] sm:$0xff] }
 0x188   : > { %v1778_v24 = vpop.f32.mrb[2].mxu0  ;;  %v1780_v25 = vpop.f32.mrb[2].mxu1  ;;  %702 = vmatprep.mubr.f32.mxu0 %v503_v10  ;;  %772 = vmatprep.mubr.f32.mxu1 %v505_v11  ;;  %v1267_v10 = vpack.c.bf16 %v601_v3, %v600_v2  ;;  %v1299_v11 = vpack.c.bf16 %v633_v5, %v632_v4  ;;  %v933_v2 = vunpack.c.l.s4 %v1426_v1 }
 0x189   : > { %v428_v29 = vpop.f32.mrb[3].mxu0  ;;  %v499_v30 = vpop.f32.mrb[3].mxu1  ;;  %703 = vmatmul.mubr.f32.vlgmr.msra.gmra.mrb[4].mxu0 %v502_v17  ;;  %773 = vmatmul.mubr.f32.vlgmr.msra.gmra.mrb[4].mxu1 %v504_v18  ;;  %v634_v17 = vld [vmem:[%s1977_s2 + $0x3e0] sm:$0xff]  ;;  %v635_v18 = vld [vmem:[%s1977_s2 + $0x3e8] sm:$0xff]  ;;  %v506_v43 = vmax.f32 %v1778_v24, 0.0  ;;  %v508_v44 = vmax.f32 %v1780_v25, 0.0 }
 0x18a   : > { %v507_v31 = vmax.f32 %v428_v29, 0.0  ;;  %v509_v32 = vmax.f32 %v499_v30, 0.0  ;;  %1250 = vmatpush3.bf16.msra.mxu0 %v1249_v12  ;;  %1282 = vmatpush3.bf16.msra.mxu1 %v1281_v13  ;;  %v616_v12 = vld [vmem:[%s1977_s2 + $0x350] sm:$0xff]  ;;  %v617_v13 = vld [vmem:[%s1977_s2 + $0x358] sm:$0xff]  ;;  %v1303_v26 = vpack.c.bf16 %v635_v18, %v634_v17  ;;  %v934_v3 = vunpack.c.0.s8 %v933_v2 }
 0x18b   : > { %1252 = vmatprep.subr.bf16.mxu0 %v1251_v19  ;;  %1284 = vmatprep.subr.bf16.mxu1 %v1283_v20  ;;  %v1269_v19 = vpack.c.bf16 %v585_v9, %v584_v8  ;;  %v1301_v20 = vpack.c.bf16 %v617_v13, %v616_v12  ;;  %v604_v29 = vld [vmem:[%s1977_s2 + $0x2f0] sm:$0xff]  ;;  %v605_v30 = vld [vmem:[%s1977_s2 + $0x2f8] sm:$0xff] }
 0x18c   : > { %842 = vmatprep.mubr.f32.mxu0 %v507_v31  ;;  %912 = vmatprep.mubr.f32.mxu1 %v509_v32  ;;  %v636_v31 = vld [vmem:[%s1977_s2 + $0x3f0] sm:$0xff]  ;;  %v637_v32 = vld [vmem:[%s1977_s2 + $0x3f8] sm:$0xff]  ;;  %v1275_v36 = vpack.c.bf16 %v605_v30, %v604_v29  ;;  %v937_v4 = vsub.s32 %v934_v3, %v1526_v16 }
 0x18e   : > { %1254 = vmatpush3.bf16.msra.mxu0 %v1253_v33  ;;  %1286 = vmatpush3.bf16.msra.mxu1 %v1285_v34  ;;  %v1273_v33 = vpack.c.bf16 %v587_v22, %v586_v21  ;;  %v1305_v34 = vpack.c.bf16 %v619_v28, %v618_v27 }
 0x18f   : > { %1256 = vmatprep.subr.bf16.mxu0 %v1255_v37  ;;  %1288 = vmatprep.subr.bf16.mxu1 %v1287_v38  ;;  %v1307_v37 = vpack.c.bf16 %v637_v32, %v636_v31  ;;  %v589_v38 = vld [vmem:[%s1977_s2 + $0x278] sm:$0xff] }
 0x190   : > { %v1277_v41 = vpack.c.bf16 %v589_v38, %v588_v35 }
 0x192   : > { %1258 = vmatpush3.bf16.msra.mxu0 %v1257_v45  ;;  %1290 = vmatpush3.bf16.msra.mxu1 %v1289_v46 }
 0x193   : > { %1260 = vmatprep.subr.bf16.mxu0 %v1259_v49  ;;  %1292 = vmatprep.subr.bf16.mxu1 %v1291_v50 }
 0x196   : > { %1262 = vmatpush3.bf16.msra.mxu0 %v1261_v57  ;;  %1294 = vmatpush3.bf16.msra.mxu1 %v1293_v58 }
 0x197   : > { %1264 = vmatprep.subr.bf16.mxu0 %v1263_v61  ;;  %1296 = vmatprep.subr.bf16.mxu1 %v1295_v62  ;;  %v926_v61 = vsub.s32 0, %v1526_v16 }
 0x19a   : > { %1266 = vmatpush3.bf16.msra.mxu0 %v1265_v6  ;;  %1298 = vmatpush3.bf16.msra.mxu1 %v1297_v7 }
 0x19b   : > { %1268 = vmatprep.subr.bf16.mxu0 %v1267_v10  ;;  %1300 = vmatprep.subr.bf16.mxu1 %v1299_v11 }
 0x19e   : > { %1270 = vmatpush3.bf16.msra.mxu0 %v1269_v19  ;;  %1302 = vmatpush3.bf16.msra.mxu1 %v1301_v20 }
 0x19f   : > { %1272 = vmatprep.subr.bf16.mxu0 %v1271_v23  ;;  %1304 = vmatprep.subr.bf16.mxu1 %v1303_v26 }
 0x1a2   : > { %1274 = vmatpush3.bf16.msra.mxu0 %v1273_v33  ;;  %1306 = vmatpush3.bf16.msra.mxu1 %v1305_v34 }
 0x1a3   : > { %1276 = vmatprep.subr.bf16.mxu0 %v1275_v36  ;;  %1308 = vmatprep.subr.bf16.mxu1 %v1307_v37 }
 0x1a6   : > { %1278 = vmatpush3.bf16.msra.mxu0 %v1277_v41  ;;  %1310 = vmatpush3.bf16.msra.mxu1 %v1309_v42 }
 0x1a9   : > { %843 = vmatmul.mubr.f32.vlgmr.msra.gmra.mrb[6].mxu0 %v506_v43  ;;  %913 = vmatmul.mubr.f32.vlgmr.msra.gmra.mrb[6].mxu1 %v508_v44 }
 0x25c   : > { %v1075_v45 = vpop.f32.mrb[4].mxu0  ;;  %v1110_v46 = vpop.f32.mrb[4].mxu1 }
 0x25d   : > { %v1076_v47 = vpop.f32.mrb[5].mxu0  ;;  %v1111_v48 = vpop.f32.mrb[5].mxu1 }
 0x25e   : > { %v1077_v49 = vadd.f32 %v1076_v47, %v1075_v45  ;;  %v1112_v50 = vadd.f32 %v1111_v48, %v1110_v46 }
 0x260   : > { %v775_v51 = vadd.f32 %v1112_v50, %v1077_v49 }
 0x27c   : > { %v1145_v52 = vpop.f32.mrb[6].mxu0  ;;  %v1180_v53 = vpop.f32.mrb[6].mxu1 }
 0x27d   : > { %v1146_v54 = vpop.f32.mrb[7].mxu0  ;;  %v1181_v55 = vpop.f32.mrb[7].mxu1 }
 0x27e   : > { %v1147_v56 = vadd.f32 %v1146_v54, %v1145_v52  ;;  %v1182_v57 = vadd.f32 %v1181_v55, %v1180_v53 }
 0x280   : > { %v845_v58 = vadd.f32 %v1147_v56, %v775_v51 }
 0x282   : > { %v915_v24 = vadd.f32 %v1182_v57, %v845_v58 }
 0x284   : > { %v1035_v59 = vmul.f32 -1.442695, %v915_v24 }
 0x286   : > { %1357 = vpow2.f32 %v1035_v59 }
 0x290   : > { %v1358_v25 = vpop.eup %1357 }
 0x291   : > { %v921_v60 = vadd.f32 1.0, %v1358_v25 }
 0x293   : > { %1359 = vrcp.f32 %v921_v60 }
 0x29d   : > { %v1360_v62 = vpop.eup %1359 }
 0x29e   : > { %v927_v63 = vrot.slane %v1360_v62, %v926_v61 }
 0x2a0   : > { %929 = vbcast.lane.b32.xlu0 %v927_v63, 256 }
 0x312   : > { %v930_v5 = vpop.permute.xlu0 %929 }
 0x313   : > { %v938_v6 = vrot.slane %v930_v5, %v937_v4 }
 0x315   : > { %v940_v7 = vmul.f32 %v938_v6, %v1501_v0 }
 0x317   : > { %941 = vst [vmem:[%s163_s26] sm:$0xff] %v940_v7 }
 0x318   : > { %1374 = shalt.err (!%p1371_p3)
}
 0x319   : > { %s1375_s8 = scalar_lea.hbm %s1933_s30, 128  ;;  %s1379_s11 = scalar_lea.hbm %s1978_s3, 256 }
 0x31a   : > { %p1376_p4 = scmp.ne.s32.totalorder %s1933_s30, %s1375_s8  ;;  %p1380_p9 = scmp.lt.u32.totalorder %s1933_s30, %s1978_s3 }
 0x31b   : > { %p1381_p10 = scmp.lt.u32.totalorder %s1379_s11, %s1375_s8  ;;  %p1383_p12 = scmp.lt.u32.totalorder %s1375_s8, %s1933_s30 }
 0x31c   : > { %p1377_p7 = pnand %p1376_p4, %p1486_p5 }
 0x31d   : > { %p1382_p11 = por %p1381_p10, %p1380_p9 }
 0x31e   : > { %p1378_p8 = pneg %p1377_p7 }
 0x31f   : > { %p1384_p13 = por %p1383_p12, %p1382_p11 }
 0x321   : > { %p1385_p0 = pnand %p1384_p13, %p1378_p8 }
 0x323   : > { %1388 = shalt.err (!%p1385_p0)
}
 0x324   : > { %1311 = dma.vmem_to_hbm [thread:$0]  (%p1486_p5), %s1935_s27, 128, %s1933_s30, %s943_s4  }
 0x325 PF: > { %p1317_p1 = scmp.ge.s32.totalorder %s1423_s15, 2  ;;  %s969_s20 = sand.u32 1, %s1411_s12  }
 0x326   : > { %s970_s24 = scalar_lea.sflag [#allocation3], %s969_s20 }
 0x327   : > { %p1314_p2 = pnand %p1317_p1, %p1490_p6 }
 0x329   : > { %1406 = dma.done.wait (!%p1314_p2), %s970_s24, 128  }
 0x32a   : > { %1408 = vsyncadd (!%p1314_p2), %s970_s24, 4294967168  ;;  %p13_p3 = scmp.ge.s32.totalorder %s1473_s18, 4   ;;  %s1981_s12 = smov %s1415_s13 }
 0x32b   : > { %s1982_s13 = smov %s1419_s14  ;;  %s1983_s14 = smov %s1484_s21 }
 0x32c   : > { %s1984_s15 = smov %s1473_s18  ;;  %15 = sbr.rel (!%p13_p3) target bundleno = 3 (0x3), region = 67 }
 0x333   :  { %975 = vsyncpa [#allocation3], 1 }
 0x334   :  { %977 = vsyncpa [#allocation3 + $0x1], 1 }

</bundles_post_ra>
